<compile_context>
chip_gen: v5e
topology: v5e:2x2
jax: 0.10.0
libtpu: 0.0.40
codegen_flags: <defaults>
</compile_context>

<pallas_src>
import functools

import jax
import jax.numpy as jnp
from jax.experimental import pallas as pl
from jax.experimental.pallas import tpu as pltpu


# ------------------------------ helpers -------------------------------------

def _round_up(a, m):
    return ((a + m - 1) // m) * m


def _apply_activation(out, activation):
    # `out` is float32; activation math stays in f32 (v5e VPU/EUP lack bf16).
    if activation == 'tanh':
        return jnp.tanh(out)
    if activation == 'relu':
        return jnp.maximum(out, 0.0)
    if activation == 'sigmoid':
        return jax.nn.sigmoid(out)
    if activation == 'leaky_relu':
        return jnp.where(out >= 0.0, out, 0.01 * out)
    if activation == 'elu':
        return jax.nn.elu(out)
    if activation == 'selu':
        return jax.nn.selu(out)
    if activation == 'softplus':
        return jax.nn.softplus(out)
    if activation == 'softsign':
        return jax.nn.soft_sign(out)
    if activation == 'sin':
        return jnp.sin(out)
    if activation == 'identity':
        return out
    # TODO(synk): softmax/log_softmax/threshold/prelu/rrelu/... from
    # Layer.get_act are row-wise or parameterized and not wired up here.
    raise ValueError(f'unsupported activation: {activation}')


# ----------------------------- Pallas kernels -------------------------------

def _layer_kernel_bias(x_ref, w_ref, b_ref, o_ref, *, activation):
    # x_ref: (tile_n, K) bf16   w_ref: (K, tile_no) bf16   b_ref: (1, tile_no) f32
    out = jnp.dot(x_ref[...], w_ref[...], preferred_element_type=jnp.float32)
    out = out + b_ref[...]
    o_ref[...] = _apply_activation(out, activation).astype(o_ref.dtype)


def _layer_kernel_nobias(x_ref, w_ref, o_ref, *, activation):
    out = jnp.dot(x_ref[...], w_ref[...], preferred_element_type=jnp.float32)
    o_ref[...] = _apply_activation(out, activation).astype(o_ref.dtype)


# ------------------------------- wrapper -------------------------------------

def layer_forward(x, weight, bias, *, activation='tanh', monoto_mode=0,
                  compute_dtype=jnp.bfloat16, tile_n=512):
    """Pallas implementation of Layer.forward (inference, drop_out=False).

    x:      [..., dim_in]
    weight: [dim_out, dim_in]   (PyTorch nn.Linear convention)
    bias:   [dim_out] or None
    """
    orig_shape = x.shape
    din = orig_shape[-1]
    dout, din_w = weight.shape
    assert din_w == din, (din_w, din)

    x2d = x.reshape(-1, din).astype(jnp.float32)
    n = x2d.shape[0]

    # --- static parameter transform (hoisted out of the per-tile loop) ------
    w = weight.astype(jnp.float32)
    if monoto_mode == 1:
        w = jnp.abs(w)
    elif monoto_mode == -1:
        w = -jnp.abs(w)
    elif monoto_mode != 0:
        raise ValueError(f'Wrong monoto_mode = {monoto_mode}')
    w_t = w.T  # (din, dout): contraction dim leading, dim_out on the lane axis

    # --- pad to MXU / vreg friendly shapes (lane-dense loads & stores) ------
    din_pad = _round_up(din, 128)
    dout_pad = _round_up(dout, 128)
    if dout_pad <= 512:
        tile_no = dout_pad
    else:
        tile_no = next(c for c in (512, 384, 256, 128) if dout_pad % c == 0)

    # Row tile: multiple of 16 (covers bf16 sublane packing), no remainder.
    tile_n = max(16, _round_up(min(tile_n, _round_up(n, 16)), 16))
    n_pad = _round_up(n, tile_n)

    x_p = jnp.pad(x2d, ((0, n_pad - n), (0, din_pad - din))).astype(compute_dtype)
    w_p = jnp.pad(w_t, ((0, din_pad - din), (0, dout_pad - dout))).astype(compute_dtype)

    use_bias = bias is not None
    args = [x_p, w_p]
    in_specs = [
        pl.BlockSpec((tile_n, din_pad), lambda i, j: (i, 0)),
        pl.BlockSpec((din_pad, tile_no), lambda i, j: (0, j)),
    ]
    if use_bias:
        b_p = jnp.pad(bias.reshape(1, dout).astype(jnp.float32),
                      ((0, 0), (0, dout_pad - dout)))
        args.append(b_p)
        in_specs.append(pl.BlockSpec((1, tile_no), lambda i, j: (0, j)))
        kernel = functools.partial(_layer_kernel_bias, activation=activation)
    else:
        kernel = functools.partial(_layer_kernel_nobias, activation=activation)

    transcendental_acts = ('tanh', 'sigmoid', 'softplus', 'elu', 'selu', 'sin',
                           'softsign')
    cost = pl.CostEstimate(
        flops=2 * n_pad * din_pad * dout_pad,
        transcendentals=(n_pad * dout_pad
                         if activation in transcendental_acts else 0),
        bytes_accessed=(x_p.size * x_p.dtype.itemsize
                        + w_p.size * w_p.dtype.itemsize
                        + n_pad * dout_pad * 4
                        + (dout_pad * 4 if use_bias else 0)),
    )

    out2d = pl.pallas_call(
        kernel,
        out_shape=jax.ShapeDtypeStruct((n_pad, dout_pad), jnp.float32),
        grid_spec=pltpu.PrefetchScalarGridSpec(
            num_scalar_prefetch=0,
            grid=(n_pad // tile_n, dout_pad // tile_no),
            in_specs=in_specs,
            out_specs=pl.BlockSpec((tile_n, tile_no), lambda i, j: (i, j)),
        ),
        compiler_params=pltpu.CompilerParams(
            dimension_semantics=("parallel", "parallel")),
        cost_estimate=cost,
    )(*args)

    return out2d[:n, :dout].reshape(*orig_shape[:-1], dout)


# --------------------- deterministic parameter init -------------------------

def cal_gain(act):
    # nn.init.calculate_gain equivalents
    gains = {'sigmoid': 1.0, 'tanh': 5.0 / 3.0, 'relu': 2.0 ** 0.5,
             'leaky_relu': (2.0 / (1.0 + 0.01 ** 2)) ** 0.5,
             'selu': 3.0 / 4.0}
    return gains.get(act, 1.0)


def init_layer_params(key, dim_in, dim_out, use_bias=True, activation='tanh'):
    # xavier_normal_ with gain = calculate_gain(activation)
    kw, kb = jax.random.split(key)
    gain = cal_gain(activation)
    std = gain * (2.0 / (dim_in + dim_out)) ** 0.5
    weight = std * jax.random.normal(kw, (dim_out, dim_in), dtype=jnp.float32)
    if use_bias:
        w_std = 1.0 / dim_in
        bias = jax.random.uniform(kb, (dim_out,), dtype=jnp.float32,
                                  minval=-w_std, maxval=w_std)
    else:
        bias = None
    return weight, bias


# --------------------------------- demo -------------------------------------

if __name__ == "__main__":
    key = jax.random.PRNGKey(0)
    k_x, k_p = jax.random.split(key)

    dim_in, dim_out = 32, 32
    batch, seq = 2, 8                      # x: (2, 8, 32) -> flattened N = 16
    x = jax.random.normal(k_x, (batch, seq, dim_in), dtype=jnp.float32)

    weight, bias = init_layer_params(k_p, dim_in, dim_out,
                                     use_bias=True, activation='tanh')

    # Reference uses the same bf16-rounded operands as the kernel's MXU path
    # (f32 accumulation), so only summation-order noise remains.
    xb = x.reshape(-1, dim_in).astype(jnp.bfloat16).astype(jnp.float32)
    wb = weight.astype(jnp.bfloat16).astype(jnp.float32)
    wb_abs = jnp.abs(weight).astype(jnp.bfloat16).astype(jnp.float32)

    # monoto_mode = 0 (plain linear), activation = tanh, drop_out = False
    out = layer_forward(x, weight, bias, activation='tanh', monoto_mode=0)
    out = jax.block_until_ready(out)
    ref = jnp.tanh(xb @ wb.T + bias[None, :]).reshape(batch, seq, dim_out)
    assert out.shape == (batch, seq, dim_out)
    assert jnp.allclose(out, ref, atol=1e-3, rtol=1e-3)

    # monoto_mode = 1 path (abs weights)
    out_m = layer_forward(x, weight, bias, activation='tanh', monoto_mode=1)
    out_m = jax.block_until_ready(out_m)
    ref_m = jnp.tanh(xb @ wb_abs.T + bias[None, :]).reshape(batch, seq, dim_out)
    assert jnp.allclose(out_m, ref_m, atol=1e-3, rtol=1e-3)

    # no-bias path (bias operand dropped entirely, relu activation)
    out_nb = layer_forward(x, weight, None, activation='relu', monoto_mode=0)
    out_nb = jax.block_until_ready(out_nb)
    ref_nb = jnp.maximum(xb @ wb.T, 0.0).reshape(batch, seq, dim_out)
    assert jnp.allclose(out_nb, ref_nb, atol=1e-3, rtol=1e-3)

    print("KERNEL_OK")
</pallas_src>

<mosaic_0001>
module attributes {stable_mosaic.version = 11 : i64} {
  func.func @_layer_kernel_bias(%arg0: i32, %arg1: i32, %arg2: memref<16x128xbf16, #tpu.memory_space<vmem>>, %arg3: memref<128x128xbf16, #tpu.memory_space<vmem>>, %arg4: memref<1x128xf32, #tpu.memory_space<vmem>>, %arg5: memref<16x128xf32, #tpu.memory_space<vmem>>) attributes {dimension_semantics = [#tpu.dimension_semantics<parallel>, #tpu.dimension_semantics<parallel>], iteration_bounds = array<i64: 1, 1>, scalar_prefetch = 0 : i64, scratch_operands = 0 : i64, tpu.core_type = #tpu.core_type<tc>, window_params = [{transform_indices = @transform_0, window_bounds = array<i64: 16, 128>}, {transform_indices = @transform_1, window_bounds = array<i64: 128, 128>}, {transform_indices = @transform_2, window_bounds = array<i64: 1, 128>}, {transform_indices = @transform_3, window_bounds = array<i64: 16, 128>}]} {
    %c0 = arith.constant 0 : index
    %c0_0 = arith.constant 0 : index
    %0 = vector.load %arg2[%c0, %c0_0] : memref<16x128xbf16, #tpu.memory_space<vmem>>, vector<16x128xbf16>
    %c0_1 = arith.constant 0 : index
    %c0_2 = arith.constant 0 : index
    %1 = vector.load %arg3[%c0_1, %c0_2] : memref<128x128xbf16, #tpu.memory_space<vmem>>, vector<128x128xbf16>
    %cst = arith.constant dense<0.000000e+00> : vector<16x128xf32>
    %2 = tpu.matmul %0, %1, %cst {dimension_numbers = #tpu.dot_dimension_numbers<[1], [0], [0], [1], [0, 0, 1, 1], [], []>} : vector<16x128xbf16>, vector<128x128xbf16>, vector<16x128xf32> -> vector<16x128xf32>
    %c0_3 = arith.constant 0 : index
    %c0_4 = arith.constant 0 : index
    %3 = vector.load %arg4[%c0_3, %c0_4] : memref<1x128xf32, #tpu.memory_space<vmem>>, vector<1x128xf32>
    %4 = vector.broadcast %3 : vector<1x128xf32> to vector<16x128xf32>
    %5 = arith.addf %2, %4 : vector<16x128xf32>
    %6 = math.tanh %5 : vector<16x128xf32>
    %c0_5 = arith.constant 0 : index
    %c0_6 = arith.constant 0 : index
    %7 = vector.load %arg5[%c0_5, %c0_6] : memref<16x128xf32, #tpu.memory_space<vmem>>, vector<16x128xf32>
    tpu.vector_store %arg5[%c0_5, %c0_6], %6 {strides = array<i32>} : memref<16x128xf32, #tpu.memory_space<vmem>>, vector<16x128xf32>,
    return
  }
  func.func @transform_0(%arg0: i32, %arg1: i32) -> (i32, i32) {
    %c0_i32 = arith.constant 0 : i32
    %c0_i32_0 = arith.constant 0 : i32
    return %arg0, %c0_i32 : i32, i32
  }
  func.func @transform_1(%arg0: i32, %arg1: i32) -> (i32, i32) {
    %c0_i32 = arith.constant 0 : i32
    %c0_i32_0 = arith.constant 0 : i32
    return %c0_i32, %arg1 : i32, i32
  }
  func.func @transform_2(%arg0: i32, %arg1: i32) -> (i32, i32) {
    %c0_i32 = arith.constant 0 : i32
    %c0_i32_0 = arith.constant 0 : i32
    return %c0_i32, %arg1 : i32, i32
  }
  func.func @transform_3(%arg0: i32, %arg1: i32) -> (i32, i32) {
    %c0_i32 = arith.constant 0 : i32
    return %arg0, %arg1 : i32, i32
  }
}

</mosaic_0001>

<bundles_post_ra>
// kernel: tpu_custom_call.1
= control target key start
LH: loop header
LB: loop body
LE: loop exit
PB: predicated region body
PF: predicated region fallthrough
CT: control target
= control target key end

     0   :  { %8 = vsyncpa [#allocation3], 0  ;;  %s335_s0 = inlined_call_operand.hbm [shape: bf16[16,128], index: 0, kind: input, shape index: {}]   ;;  %s336_s1 = inlined_call_operand.hbm [shape: bf16[128,128], index: 1, kind: input, shape index: {}]   ;;  %s337_s2 = inlined_call_operand.vmem [shape: f32[1,128], index: 2, kind: input, shape index: {}]   ;;  %s338_s3 = inlined_call_operand.hbm [shape: f32[16,128], index: 3, kind: output, shape index: {}]  }
   0x1   :  { %9 = vsyncpa [#allocation6], 0 }
   0x2   :  { %10 = vsyncpa [#allocation4], 0  ;;  %s15_s14 = sshll.u32 %s335_s0, 4  ;;  %s296_s15 = smov [#allocation2]   ;;  %s16_s14 = int_to_ptr.hbm [resolvable:$true] %s15_s14 }
   0x3   :  { %s17_s16 = sshll.u32 %s296_s15, 4  ;;  %s28_s19 = sshll.u32 %s336_s1, 4  ;;  %s18_s16 = int_to_ptr.vmem [resolvable:$true] %s17_s16  ;;  %s29_s19 = int_to_ptr.hbm [resolvable:$true] %s28_s19 }
   0x4   :  { %s297_s20 = smov 64   ;;  %s298_s21 = smov 4  }
   0x5   :  { %23 = dma.hbm_to_vmem [thread:$0]  %s16_s14, 128, %s18_s16, [#allocation3], %s297_s20, %s297_s20, %s298_s21  }
   0x6   :  { %s299_s22 = smov [#allocation5]  }
   0x7   :  { %s30_s23 = sshll.u32 %s299_s22, 4  ;;  %s31_s23 = int_to_ptr.vmem [resolvable:$true] %s30_s23 }
   0x8   :  { %36 = dma.hbm_to_vmem [thread:$0]  %s29_s19, 1024, %s31_s23, [#allocation6], %s297_s20, %s297_s20, %s298_s21  }
   0x9   :  { %290 = dma.done.wait [#allocation3], 128  }
   0xa   :  { %291 = vsyncadd [#allocation3], 4294967168 }
   0xb   :  { %292 = dma.done.wait [#allocation6], 1024  }
   0xc   :  { %293 = vsyncadd [#allocation6], 4294966272  ;;  %v205_v0 = vld [vmem:[#allocation5 + $0x38] sm:$0xff]  ;;  %v204_v1 = vld [vmem:[#allocation5 + $0x30] sm:$0xff]  ;;  %s300_s24 = smov [#allocation7]   ;;  %s147_s28 = sshll.u32 %s338_s3, 4  ;;  %s148_s28 = int_to_ptr.hbm [resolvable:$true] %s147_s28 }
   0xd   :  { %123 = vmatpush.bf16.msra.mxu0 %v205_v0  ;;  %v203_v2 = vld [vmem:[#allocation5 + $0x28] sm:$0xff]  ;;  %v202_v3 = vld [vmem:[#allocation5 + $0x20] sm:$0xff]  ;;  %v201_v4 = vld [vmem:[#allocation5 + $0x18] sm:$0xff]  ;;  %s145_s25 = sshll.u32 %s300_s24, 4  ;;  %s301_s29 = smov 128   ;;  %s146_s25 = int_to_ptr.vmem [resolvable:$true] %s145_s25 }
   0xe   :  { %v200_v5 = vld [vmem:[#allocation5 + $0x10] sm:$0xff]  ;;  %v199_v6 = vld [vmem:[#allocation5 + $0x8] sm:$0xff]  ;;  %v198_v7 = vld [vmem:[#allocation5] sm:$0xff] }
   0xf   :  { %v197_v8 = vld [vmem:[#allocation2] sm:$0xff] }
  0x10   :  { %v213_v9 = vld [vmem:[%s337_s2] ss:$0 sm:$0xff]  ;;  %s302_s2 = smov 8  }
  0x11   :  { %124 = vmatpush.bf16.msra.mxu0 %v204_v1 }
  0x15   :  { %125 = vmatpush.bf16.msra.mxu0 %v203_v2 }
  0x19   :  { %126 = vmatpush.bf16.msra.mxu0 %v202_v3 }
  0x1d   :  { %127 = vmatpush.bf16.msra.mxu0 %v201_v4 }
  0x21   :  { %128 = vmatpush.bf16.msra.mxu0 %v200_v5 }
  0x25   :  { %129 = vmatpush.bf16.msra.mxu0 %v199_v6 }
  0x29   :  { %130 = vmatpush.bf16.msra.mxu0 %v198_v7 }
  0x2c   :  { %131 = vmatmul.bf16.vlgmr.msra.gmra.mxu0 %v197_v8 }
  0xa9   :  { %v132_v10 = vpop.f32.mrf.mxu0 }
  0xaa   :  { %v133_v11 = vadd.f32 %v213_v9, %v132_v10 }
  0xac   :  { %214 = vtanh.f32 %v133_v11 }
  0xb1   :  { %v134_v12 = vpop.f32.mrf.mxu0 }
  0xb2   :  { %v215_v13 = vpop.eup %214  ;;  %v135_v14 = vadd.f32 %v213_v9, %v134_v12 }
  0xb3   :  { %139 = vst [vmem:[#allocation7] sm:$0xff] %v215_v13 }
  0xb4   :  { %216 = vtanh.f32 %v135_v14 }
  0xba   :  { %v217_v15 = vpop.eup %216 }
  0xbb   :  { %140 = vst [vmem:[#allocation7 + $0x8] sm:$0xff] %v217_v15 }
  0xbc   :  { %153 = dma.vmem_to_hbm [thread:$0]  %s146_s25, 256, %s148_s28, [#allocation4], %s301_s29, %s301_s29, %s302_s2  }
  0xbd   :  { %294 = dma.done.wait [#allocation4], 256  }
  0xbe   :  { %295 = vsyncadd [#allocation4], 4294967040 }
  0xbf   :  { %158 = vsyncpa [#allocation3], 1 }
  0xc0   :  { %159 = vsyncpa [#allocation6], 1 }
  0xc1   :  { %160 = vsyncpa [#allocation4], 1 }

</bundles_post_ra>
